<compile_context>
chip_gen: v6e
topology: v6e:2x2x1
jax: 0.10.0
libtpu: 0.0.40
codegen_flags: <defaults>
</compile_context>

<pallas_src>
import jax
import jax.numpy as jnp
from jax.experimental import pallas as pl
from jax.experimental.pallas import tpu as pltpu

HIDDEN = 768
VOCAB = 21128
MAX_POS = 512
N_TYPES = 2
LN_EPS = 1e-12


# ---------------------------------------------------------------------------
# Fused kernel: gather 3 embedding rows per token (manual DMA), sum, LayerNorm
# ---------------------------------------------------------------------------
def embed_ln_kernel(wid_ref, pid_ref, tid_ref,        # scalar prefetch (SMEM): flat ids, (M,)
                    wtab_ref, ptab_ref, ttab_ref,     # embedding tables, resident in HBM
                    gamma_ref, beta_ref,              # LN params, (1, 768) VMEM, resident
                    o_ref,                            # (TM, 768) output tile (VMEM)
                    wbuf, pbuf, tbuf,                 # (TM, 768) VMEM gather scratch
                    sem):                             # DMA semaphores, (3, TM)
    tm = o_ref.shape[0]
    base = pl.program_id(0) * tm

    # Issue all 3*TM row-gather DMAs (HBM table row -> VMEM scratch row).
    # All SMEM id reads happen before any .wait() (keeps sst->sld forwarding).
    @pl.loop(0, tm)
    def _(r):
        pltpu.make_async_copy(
            wtab_ref.at[pl.ds(wid_ref[base + r], 1), :],
            wbuf.at[pl.ds(r, 1), :], sem.at[0, r]).start()
        pltpu.make_async_copy(
            ptab_ref.at[pl.ds(pid_ref[base + r], 1), :],
            pbuf.at[pl.ds(r, 1), :], sem.at[1, r]).start()
        pltpu.make_async_copy(
            ttab_ref.at[pl.ds(tid_ref[base + r], 1), :],
            tbuf.at[pl.ds(r, 1), :], sem.at[2, r]).start()

    # Wait for completion (wait is defined by sem + dst; src index irrelevant).
    @pl.loop(0, tm)
    def _(r):
        pltpu.make_async_copy(wtab_ref.at[pl.ds(0, 1), :],
                              wbuf.at[pl.ds(r, 1), :], sem.at[0, r]).wait()
        pltpu.make_async_copy(ptab_ref.at[pl.ds(0, 1), :],
                              pbuf.at[pl.ds(r, 1), :], sem.at[1, r]).wait()
        pltpu.make_async_copy(ttab_ref.at[pl.ds(0, 1), :],
                              tbuf.at[pl.ds(r, 1), :], sem.at[2, r]).wait()

    # Sum of embeddings + TF-style LayerNorm (eps inside the sqrt), all in f32.
    e = wbuf[...] + pbuf[...] + tbuf[...]               # (TM, 768)
    u = jnp.mean(e, axis=-1, keepdims=True)
    d = e - u
    s = jnp.mean(d * d, axis=-1, keepdims=True)
    xn = d * jax.lax.rsqrt(s + LN_EPS)                  # rsqrt -> EUP, mul -> VPU
    o_ref[...] = gamma_ref[...] * xn + beta_ref[...]    # lane-dense (TM, 768) store


# ---------------------------------------------------------------------------
# Wrapper
# ---------------------------------------------------------------------------
def transformer_encoder_embeddings(input_ids, past_length, params, token_type_ids=None):
    """input_ids: [B, S] int32. Returns [B, S, 768] float32 embeddings."""
    B, S = input_ids.shape
    M = B * S

    position_ids = jnp.arange(past_length, past_length + S, dtype=jnp.int32)
    position_ids = jnp.broadcast_to(position_ids[None, :], (B, S))
    if token_type_ids is None:
        token_type_ids = jnp.zeros((B, S), dtype=jnp.int32)

    wid = input_ids.reshape(M).astype(jnp.int32)
    pid = position_ids.reshape(M).astype(jnp.int32)
    tid = token_type_ids.reshape(M).astype(jnp.int32)

    # Tokens per grid step: largest sublane-friendly divisor of M (cap 128 to
    # bound outstanding DMAs; scratch = 3 * 128 * 768 * 4B = 1.1 MiB).
    TM = next(c for c in (128, 64, 32, 16, 8, 4, 2, 1) if M % c == 0)
    n_tiles = M // TM

    grid_spec = pltpu.PrefetchScalarGridSpec(
        num_scalar_prefetch=3,
        grid=(n_tiles,),
        in_specs=[
            pl.BlockSpec(memory_space=pl.ANY),                        # word table (HBM)
            pl.BlockSpec(memory_space=pl.ANY),                        # position table (HBM)
            pl.BlockSpec(memory_space=pl.ANY),                        # token-type table (HBM)
            pl.BlockSpec((1, HIDDEN), lambda i, w, p, t: (0, 0)),     # ln gamma (resident)
            pl.BlockSpec((1, HIDDEN), lambda i, w, p, t: (0, 0)),     # ln beta  (resident)
        ],
        out_specs=pl.BlockSpec((TM, HIDDEN), lambda i, w, p, t: (i, 0)),
        scratch_shapes=[
            pltpu.VMEM((TM, HIDDEN), jnp.float32),   # gathered word rows
            pltpu.VMEM((TM, HIDDEN), jnp.float32),   # gathered position rows
            pltpu.VMEM((TM, HIDDEN), jnp.float32),   # gathered token-type rows
            pltpu.SemaphoreType.DMA((3, TM)),
        ],
    )

    out2 = pl.pallas_call(
        embed_ln_kernel,
        out_shape=jax.ShapeDtypeStruct((M, HIDDEN), jnp.float32),
        grid_spec=grid_spec,
        compiler_params=pltpu.CompilerParams(
            dimension_semantics=("parallel",),        # shard tiles across v7x's 2 TCs
            vmem_limit_bytes=32 * 1024 * 1024,        # explicit budget, safe for v7x (64 MiB)
        ),
    )(wid, pid, tid,
      params["word_emb"], params["pos_emb"], params["type_emb"],
      params["ln_g"], params["ln_b"])

    return out2.reshape(B, S, HIDDEN)


# ---------------------------------------------------------------------------
# Pure-JAX reference (sanity check)
# ---------------------------------------------------------------------------
def reference(input_ids, past_length, params, token_type_ids=None):
    B, S = input_ids.shape
    position_ids = jnp.arange(past_length, past_length + S, dtype=jnp.int32)
    position_ids = jnp.broadcast_to(position_ids[None, :], (B, S))
    if token_type_ids is None:
        token_type_ids = jnp.zeros((B, S), dtype=jnp.int32)
    e = (params["word_emb"][input_ids]
         + params["pos_emb"][position_ids]
         + params["type_emb"][token_type_ids])
    u = jnp.mean(e, axis=-1, keepdims=True)
    s = jnp.mean((e - u) ** 2, axis=-1, keepdims=True)
    xn = (e - u) / jnp.sqrt(s + LN_EPS)
    return (params["ln_g"].reshape(1, 1, HIDDEN) * xn
            + params["ln_b"].reshape(1, 1, HIDDEN))


if __name__ == "__main__":
    B, S = 2, 8
    key = jax.random.PRNGKey(0)
    k0, k1, k2, k3 = jax.random.split(key, 4)

    params = {
        "word_emb": 0.02 * jax.random.normal(k0, (VOCAB, HIDDEN), jnp.float32),
        "pos_emb": 0.02 * jax.random.normal(k1, (MAX_POS, HIDDEN), jnp.float32),
        "type_emb": 0.02 * jax.random.normal(k2, (N_TYPES, HIDDEN), jnp.float32),
        "ln_g": jnp.ones((1, HIDDEN), jnp.float32),
        "ln_b": jnp.zeros((1, HIDDEN), jnp.float32),
    }

    input_ids = jax.random.randint(k3, (B, S), 0, VOCAB, dtype=jnp.int32)
    past_length = 0

    out = transformer_encoder_embeddings(input_ids, past_length, params)
    out = jax.block_until_ready(out)
    assert out.shape == (B, S, HIDDEN)

    ref = reference(input_ids, past_length, params)
    assert jnp.allclose(out, ref, rtol=1e-3, atol=1e-3), "mismatch vs reference"

    print("KERNEL_OK")
</pallas_src>

<mosaic_0001>
module attributes {stable_mosaic.version = 11 : i64} {
  func.func @embed_ln_kernel(%arg0: i32, %arg1: memref<16xi32, #tpu.memory_space<smem>>, %arg2: memref<16xi32, #tpu.memory_space<smem>>, %arg3: memref<16xi32, #tpu.memory_space<smem>>, %arg4: memref<21128x768xf32, #tpu.memory_space<any>>, %arg5: memref<512x768xf32, #tpu.memory_space<any>>, %arg6: memref<2x768xf32, #tpu.memory_space<any>>, %arg7: memref<1x768xf32, #tpu.memory_space<vmem>>, %arg8: memref<1x768xf32, #tpu.memory_space<vmem>>, %arg9: memref<16x768xf32, #tpu.memory_space<vmem>>, %arg10: memref<16x768xf32, #tpu.memory_space<vmem>>, %arg11: memref<16x768xf32, #tpu.memory_space<vmem>>, %arg12: memref<16x768xf32, #tpu.memory_space<vmem>>, %arg13: memref<3x16x!tpu.dma_semaphore, #tpu.memory_space<semaphore_mem>>) attributes {dimension_semantics = [#tpu.dimension_semantics<parallel>], iteration_bounds = array<i64: 1>, scalar_prefetch = 3 : i64, scratch_operands = 4 : i64, tpu.core_type = #tpu.core_type<tc>, window_params = [{}, {}, {}, {pipeline_mode = #tpu.pipeline_mode<synchronous>, transform_indices = @transform_3, window_bounds = array<i64: 1, 768>}, {pipeline_mode = #tpu.pipeline_mode<synchronous>, transform_indices = @transform_4, window_bounds = array<i64: 1, 768>}, {transform_indices = @transform_5, window_bounds = array<i64: 16, 768>}]} {
    %c16_i32 = arith.constant 16 : i32
    %0 = arith.muli %arg0, %c16_i32 : i32
    %c0_i32 = arith.constant 0 : i32
    %c16_i32_0 = arith.constant 16 : i32
    %1 = arith.addi %c0_i32, %c16_i32_0 : i32
    %c1_i32 = arith.constant 1 : i32
    scf.for %arg14 = %c0_i32 to %1 step %c1_i32  : i32 {
      %c1_i32_21 = arith.constant 1 : i32
      %31 = arith.muli %arg14, %c1_i32_21 : i32
      %c0_i32_22 = arith.constant 0 : i32
      %32 = arith.addi %c0_i32_22, %31 : i32
      %33 = arith.addi %0, %32 : i32
      %34 = arith.index_cast %33 : i32 to index
      %35 = memref.load %arg1[%34] : memref<16xi32, #tpu.memory_space<smem>>
      %c0_i32_23 = arith.constant 0 : i32
      %c0_i32_24 = arith.constant 0 : i32
      %36 = tpu.memref_slice %arg4[%35, %c0_i32_24] : memref<21128x768xf32, #tpu.memory_space<any>> -> memref<1x768xf32, #tpu.memory_space<any>>
      %c0_i32_25 = arith.constant 0 : i32
      %37 = tpu.memref_slice %arg10[%32, %c0_i32_25] : memref<16x768xf32, #tpu.memory_space<vmem>> -> memref<1x768xf32, #tpu.memory_space<vmem>>
      %38 = tpu.memref_slice %arg13[%c0_i32_23, %32] : memref<3x16x!tpu.dma_semaphore, #tpu.memory_space<semaphore_mem>> -> memref<1x1x!tpu.dma_semaphore, #tpu.memory_space<semaphore_mem>>
      %39 = tpu.memref_squeeze %38 : memref<1x1x!tpu.dma_semaphore, #tpu.memory_space<semaphore_mem>> -> memref<!tpu.dma_semaphore, #tpu.memory_space<semaphore_mem>>
      tpu.enqueue_dma source(%36 : memref<1x768xf32, #tpu.memory_space<any>>) target(%37 : memref<1x768xf32, #tpu.memory_space<vmem>>) target_semaphore(%39 : memref<!tpu.dma_semaphore, #tpu.memory_space<semaphore_mem>>)
      %40 = arith.addi %0, %32 : i32
      %41 = arith.index_cast %40 : i32 to index
      %42 = memref.load %arg2[%41] : memref<16xi32, #tpu.memory_space<smem>>
      %c1_i32_26 = arith.constant 1 : i32
      %c0_i32_27 = arith.constant 0 : i32
      %43 = tpu.memref_slice %arg5[%42, %c0_i32_27] : memref<512x768xf32, #tpu.memory_space<any>> -> memref<1x768xf32, #tpu.memory_space<any>>
      %c0_i32_28 = arith.constant 0 : i32
      %44 = tpu.memref_slice %arg11[%32, %c0_i32_28] : memref<16x768xf32, #tpu.memory_space<vmem>> -> memref<1x768xf32, #tpu.memory_space<vmem>>
      %45 = tpu.memref_slice %arg13[%c1_i32_26, %32] : memref<3x16x!tpu.dma_semaphore, #tpu.memory_space<semaphore_mem>> -> memref<1x1x!tpu.dma_semaphore, #tpu.memory_space<semaphore_mem>>
      %46 = tpu.memref_squeeze %45 : memref<1x1x!tpu.dma_semaphore, #tpu.memory_space<semaphore_mem>> -> memref<!tpu.dma_semaphore, #tpu.memory_space<semaphore_mem>>
      tpu.enqueue_dma source(%43 : memref<1x768xf32, #tpu.memory_space<any>>) target(%44 : memref<1x768xf32, #tpu.memory_space<vmem>>) target_semaphore(%46 : memref<!tpu.dma_semaphore, #tpu.memory_space<semaphore_mem>>)
      %47 = arith.addi %0, %32 : i32
      %48 = arith.index_cast %47 : i32 to index
      %49 = memref.load %arg3[%48] : memref<16xi32, #tpu.memory_space<smem>>
      %c2_i32 = arith.constant 2 : i32
      %c0_i32_29 = arith.constant 0 : i32
      %50 = tpu.memref_slice %arg6[%49, %c0_i32_29] : memref<2x768xf32, #tpu.memory_space<any>> -> memref<1x768xf32, #tpu.memory_space<any>>
      %c0_i32_30 = arith.constant 0 : i32
      %51 = tpu.memref_slice %arg12[%32, %c0_i32_30] : memref<16x768xf32, #tpu.memory_space<vmem>> -> memref<1x768xf32, #tpu.memory_space<vmem>>
      %52 = tpu.memref_slice %arg13[%c2_i32, %32] : memref<3x16x!tpu.dma_semaphore, #tpu.memory_space<semaphore_mem>> -> memref<1x1x!tpu.dma_semaphore, #tpu.memory_space<semaphore_mem>>
      %53 = tpu.memref_squeeze %52 : memref<1x1x!tpu.dma_semaphore, #tpu.memory_space<semaphore_mem>> -> memref<!tpu.dma_semaphore, #tpu.memory_space<semaphore_mem>>
      tpu.enqueue_dma source(%50 : memref<1x768xf32, #tpu.memory_space<any>>) target(%51 : memref<1x768xf32, #tpu.memory_space<vmem>>) target_semaphore(%53 : memref<!tpu.dma_semaphore, #tpu.memory_space<semaphore_mem>>)
    }
    %c16_i32_1 = arith.constant 16 : i32
    %c0_i32_2 = arith.constant 0 : i32
    %c16_i32_3 = arith.constant 16 : i32
    %2 = arith.addi %c0_i32_2, %c16_i32_3 : i32
    %c1_i32_4 = arith.constant 1 : i32
    scf.for %arg14 = %c0_i32_2 to %2 step %c1_i32_4  : i32 {
      %c1_i32_21 = arith.constant 1 : i32
      %31 = arith.muli %arg14, %c1_i32_21 : i32
      %c0_i32_22 = arith.constant 0 : i32
      %32 = arith.addi %c0_i32_22, %31 : i32
      %c0_i32_23 = arith.constant 0 : i32
      %c0_i32_24 = arith.constant 0 : i32
      %c0_i32_25 = arith.constant 0 : i32
      %33 = tpu.memref_slice %arg4[%c0_i32_24, %c0_i32_25] : memref<21128x768xf32, #tpu.memory_space<any>> -> memref<1x768xf32, #tpu.memory_space<any>>
      %c0_i32_26 = arith.constant 0 : i32
      %34 = tpu.memref_slice %arg10[%32, %c0_i32_26] : memref<16x768xf32, #tpu.memory_space<vmem>> -> memref<1x768xf32, #tpu.memory_space<vmem>>
      %35 = tpu.memref_slice %arg13[%c0_i32_23, %32] : memref<3x16x!tpu.dma_semaphore, #tpu.memory_space<semaphore_mem>> -> memref<1x1x!tpu.dma_semaphore, #tpu.memory_space<semaphore_mem>>
      %36 = tpu.memref_squeeze %35 : memref<1x1x!tpu.dma_semaphore, #tpu.memory_space<semaphore_mem>> -> memref<!tpu.dma_semaphore, #tpu.memory_space<semaphore_mem>>
      tpu.wait_dma2 semaphore(%36 : memref<!tpu.dma_semaphore, #tpu.memory_space<semaphore_mem>>) src(%33 : memref<1x768xf32, #tpu.memory_space<any>>) dst(%34 : memref<1x768xf32, #tpu.memory_space<vmem>>)
      %c1_i32_27 = arith.constant 1 : i32
      %c0_i32_28 = arith.constant 0 : i32
      %c0_i32_29 = arith.constant 0 : i32
      %37 = tpu.memref_slice %arg5[%c0_i32_28, %c0_i32_29] : memref<512x768xf32, #tpu.memory_space<any>> -> memref<1x768xf32, #tpu.memory_space<any>>
      %c0_i32_30 = arith.constant 0 : i32
      %38 = tpu.memref_slice %arg11[%32, %c0_i32_30] : memref<16x768xf32, #tpu.memory_space<vmem>> -> memref<1x768xf32, #tpu.memory_space<vmem>>
      %39 = tpu.memref_slice %arg13[%c1_i32_27, %32] : memref<3x16x!tpu.dma_semaphore, #tpu.memory_space<semaphore_mem>> -> memref<1x1x!tpu.dma_semaphore, #tpu.memory_space<semaphore_mem>>
      %40 = tpu.memref_squeeze %39 : memref<1x1x!tpu.dma_semaphore, #tpu.memory_space<semaphore_mem>> -> memref<!tpu.dma_semaphore, #tpu.memory_space<semaphore_mem>>
      tpu.wait_dma2 semaphore(%40 : memref<!tpu.dma_semaphore, #tpu.memory_space<semaphore_mem>>) src(%37 : memref<1x768xf32, #tpu.memory_space<any>>) dst(%38 : memref<1x768xf32, #tpu.memory_space<vmem>>)
      %c2_i32 = arith.constant 2 : i32
      %c0_i32_31 = arith.constant 0 : i32
      %c0_i32_32 = arith.constant 0 : i32
      %41 = tpu.memref_slice %arg6[%c0_i32_31, %c0_i32_32] : memref<2x768xf32, #tpu.memory_space<any>> -> memref<1x768xf32, #tpu.memory_space<any>>
      %c0_i32_33 = arith.constant 0 : i32
      %42 = tpu.memref_slice %arg12[%32, %c0_i32_33] : memref<16x768xf32, #tpu.memory_space<vmem>> -> memref<1x768xf32, #tpu.memory_space<vmem>>
      %43 = tpu.memref_slice %arg13[%c2_i32, %32] : memref<3x16x!tpu.dma_semaphore, #tpu.memory_space<semaphore_mem>> -> memref<1x1x!tpu.dma_semaphore, #tpu.memory_space<semaphore_mem>>
      %44 = tpu.memref_squeeze %43 : memref<1x1x!tpu.dma_semaphore, #tpu.memory_space<semaphore_mem>> -> memref<!tpu.dma_semaphore, #tpu.memory_space<semaphore_mem>>
      tpu.wait_dma2 semaphore(%44 : memref<!tpu.dma_semaphore, #tpu.memory_space<semaphore_mem>>) src(%41 : memref<1x768xf32, #tpu.memory_space<any>>) dst(%42 : memref<1x768xf32, #tpu.memory_space<vmem>>)
    }
    %c16_i32_5 = arith.constant 16 : i32
    %c0 = arith.constant 0 : index
    %c0_6 = arith.constant 0 : index
    %3 = vector.load %arg10[%c0, %c0_6] : memref<16x768xf32, #tpu.memory_space<vmem>>, vector<16x768xf32>
    %c0_7 = arith.constant 0 : index
    %c0_8 = arith.constant 0 : index
    %4 = vector.load %arg11[%c0_7, %c0_8] : memref<16x768xf32, #tpu.memory_space<vmem>>, vector<16x768xf32>
    %5 = arith.addf %3, %4 : vector<16x768xf32>
    %c0_9 = arith.constant 0 : index
    %c0_10 = arith.constant 0 : index
    %6 = vector.load %arg12[%c0_9, %c0_10] : memref<16x768xf32, #tpu.memory_space<vmem>>, vector<16x768xf32>
    %7 = arith.addf %5, %6 : vector<16x768xf32>
    %cst = arith.constant dense<0.000000e+00> : vector<16xf32>
    %8 = vector.multi_reduction <add>, %7, %cst [1] : vector<16x768xf32> to vector<16xf32>
    %9 = vector.shape_cast %8 : vector<16xf32> to vector<16x1xf32>
    %cst_11 = arith.constant 7.680000e+02 : f32
    %10 = vector.broadcast %cst_11 : f32 to vector<16x1xf32>
    %11 = arith.divf %9, %10 : vector<16x1xf32>
    %12 = vector.broadcast %11 : vector<16x1xf32> to vector<16x768xf32>
    %13 = arith.subf %7, %12 : vector<16x768xf32>
    %14 = arith.mulf %13, %13 : vector<16x768xf32>
    %cst_12 = arith.constant dense<0.000000e+00> : vector<16xf32>
    %15 = vector.multi_reduction <add>, %14, %cst_12 [1] : vector<16x768xf32> to vector<16xf32>
    %16 = vector.shape_cast %15 : vector<16xf32> to vector<16x1xf32>
    %cst_13 = arith.constant 7.680000e+02 : f32
    %17 = vector.broadcast %cst_13 : f32 to vector<16x1xf32>
    %18 = arith.divf %16, %17 : vector<16x1xf32>
    %cst_14 = arith.constant 9.99999996E-13 : f32
    %19 = vector.broadcast %cst_14 : f32 to vector<16x1xf32>
    %20 = arith.addf %18, %19 : vector<16x1xf32>
    %21 = math.rsqrt %20 : vector<16x1xf32>
    %22 = vector.broadcast %21 : vector<16x1xf32> to vector<16x768xf32>
    %23 = arith.mulf %13, %22 : vector<16x768xf32>
    %c0_15 = arith.constant 0 : index
    %c0_16 = arith.constant 0 : index
    %24 = vector.load %arg7[%c0_15, %c0_16] : memref<1x768xf32, #tpu.memory_space<vmem>>, vector<1x768xf32>
    %25 = vector.broadcast %24 : vector<1x768xf32> to vector<16x768xf32>
    %26 = arith.mulf %25, %23 : vector<16x768xf32>
    %c0_17 = arith.constant 0 : index
    %c0_18 = arith.constant 0 : index
    %27 = vector.load %arg8[%c0_17, %c0_18] : memref<1x768xf32, #tpu.memory_space<vmem>>, vector<1x768xf32>
    %28 = vector.broadcast %27 : vector<1x768xf32> to vector<16x768xf32>
    %29 = arith.addf %26, %28 : vector<16x768xf32>
    %c0_19 = arith.constant 0 : index
    %c0_20 = arith.constant 0 : index
    %30 = vector.load %arg9[%c0_19, %c0_20] : memref<16x768xf32, #tpu.memory_space<vmem>>, vector<16x768xf32>
    tpu.vector_store %arg9[%c0_19, %c0_20], %29 {strides = array<i32>} : memref<16x768xf32, #tpu.memory_space<vmem>>, vector<16x768xf32>,
    return
  }
  func.func @transform_3(%arg0: i32, %arg1: memref<16xi32, #tpu.memory_space<smem>>, %arg2: memref<16xi32, #tpu.memory_space<smem>>, %arg3: memref<16xi32, #tpu.memory_space<smem>>) -> (i32, i32) {
    %c0_i32 = arith.constant 0 : i32
    %c0_i32_0 = arith.constant 0 : i32
    %c0_i32_1 = arith.constant 0 : i32
    return %c0_i32, %c0_i32_0 : i32, i32
  }
  func.func @transform_4(%arg0: i32, %arg1: memref<16xi32, #tpu.memory_space<smem>>, %arg2: memref<16xi32, #tpu.memory_space<smem>>, %arg3: memref<16xi32, #tpu.memory_space<smem>>) -> (i32, i32) {
    %c0_i32 = arith.constant 0 : i32
    %c0_i32_0 = arith.constant 0 : i32
    %c0_i32_1 = arith.constant 0 : i32
    return %c0_i32, %c0_i32_0 : i32, i32
  }
  func.func @transform_5(%arg0: i32, %arg1: memref<16xi32, #tpu.memory_space<smem>>, %arg2: memref<16xi32, #tpu.memory_space<smem>>, %arg3: memref<16xi32, #tpu.memory_space<smem>>) -> (i32, i32) {
    %c0_i32 = arith.constant 0 : i32
    %c0_i32_0 = arith.constant 0 : i32
    return %arg0, %c0_i32 : i32, i32
  }
}

</mosaic_0001>

<bundles_post_ra>
// kernel: tpu_custom_call.1
= control target key start
LH: loop header
LB: loop body
LE: loop exit
PB: predicated region body
PF: predicated region fallthrough
CT: control target
= control target key end

     0   :  { %s1013_s27 = smov [#allocation7]   ;;  %s1014_s30 = smov [#allocation8]   ;;  %s1220_s0 = inlined_call_operand.hbm [shape: s32[16], index: 0, kind: input, shape index: {}]   ;;  %s1221_s3 = inlined_call_operand.hbm [shape: f32[21128,768], index: 3, kind: input, shape index: {}]   ;;  %s1222_s4 = inlined_call_operand.hbm [shape: f32[512,768], index: 4, kind: input, shape index: {}]   ;;  %s1223_s5 = inlined_call_operand.hbm [shape: f32[2,768], index: 5, kind: input, shape index: {}]   ;;  %s1224_s6 = inlined_call_operand.hbm [shape: f32[1,768], index: 6, kind: input, shape index: {}]   ;;  %s1225_s7 = inlined_call_operand.hbm [shape: f32[1,768], index: 7, kind: input, shape index: {}]   ;;  %s1226_s8 = inlined_call_operand.hbm [shape: f32[16,768], index: 8, kind: output, shape index: {}]   ;;  %s1227_s1 = inlined_call_operand.hbm [shape: s32[16], index: 1, kind: input, shape index: {}]   ;;  %s1228_s2 = inlined_call_operand.hbm [shape: s32[16], index: 2, kind: input, shape index: {}]  }
   0x1   :  { %14 = dma.hbm_to_smem %s1220_s0, 16, %s1013_s27, [#allocation6] }
   0x2   :  { %16 = dma.hbm_to_smem %s1227_s1, 16, %s1014_s30, [#allocation6] }
   0x3   :  { %s1015_s11 = smov [#allocation9]  }
   0x4   :  { %18 = dma.hbm_to_smem %s1228_s2, 16, %s1015_s11, [#allocation6] }
   0x5   :  { %991 = dma.done.wait [#allocation6], 48 }
   0x6   :  { %992 = vsyncadd [#allocation6], 4294967248 }
   0x7   :  { %20 = sfence }
   0x8   :  { %21 = vsyncpa [#allocation11], 0 }
   0x9   :  { %22 = vsyncpa [#allocation14], 0 }
   0xa   :  { %23 = vsyncpa [#allocation12], 0  ;;  %s1016_s14 = smov [#allocation10]   ;;  %s1017_s16 = smov [#allocation13]  }
   0xb   :  { %s30_s15 = sshll.u32 %s1016_s14, 4  ;;  %s40_s0 = sshll.u32 %s1017_s16, 4  ;;  %s31_s15 = int_to_ptr.vmem [resolvable:$true] %s30_s15  ;;  %s41_s0 = int_to_ptr.vmem [resolvable:$true] %s40_s0 }
   0xc   :  { %s865_s17 = scalar_lea.vmem %s31_s15, 96  ;;  %p870_p1 = scmp.lt.s32.totalorder %s31_s15, %s31_s15 }
   0xd   :  { %p866_p0 = scmp.ne.s32.totalorder %s31_s15, %s865_s17  ;;  %p871_p2 = scmp.lt.s32.totalorder %s865_s17, %s865_s17 }
   0xf   :  { %p872_p3 = por %p871_p2, %p870_p1 }
  0x11   :  { %p873_p4 = pnand %p872_p3, %p866_p0 }
  0x13   :  { %876 = shalt.err (!%p873_p4)
}
  0x14   :  { %33 = dma.hbm_to_vmem [thread:$0]  %s1224_s6, 96, %s31_s15, [#allocation11]  }
  0x15   :  { %s885_s18 = scalar_lea.vmem %s41_s0, 96  ;;  %p890_p6 = scmp.lt.s32.totalorder %s41_s0, %s41_s0 }
  0x16   :  { %p886_p5 = scmp.ne.s32.totalorder %s41_s0, %s885_s18  ;;  %p891_p7 = scmp.lt.s32.totalorder %s885_s18, %s885_s18 }
  0x18   :  { %p892_p8 = por %p891_p7, %p890_p6 }
  0x1a   :  { %p893_p9 = pnand %p892_p8, %p886_p5 }
  0x1c   :  { %896 = shalt.err (!%p893_p9)
}
  0x1d   :  { %43 = dma.hbm_to_vmem [thread:$0]  %s1225_s7, 96, %s41_s0, [#allocation14]  }
  0x1e   :  { %993 = dma.done.wait [#allocation11], 96  }
  0x1f   :  { %994 = vsyncadd [#allocation11], 4294967200 }
  0x20   :  { %995 = dma.done.wait [#allocation14], 96  }
  0x21   :  { %996 = vsyncadd [#allocation14], 4294967200  ;;  %s1087_s21 = smov 0  }
  0x22 LB: > { %s58_s6 = sld [smem:[#allocation7 + %s1007_s21]]  ;;  %s65_s22 = sshrl.u32 %s1007_s21, 3  ;;  %s1007_s21 = sphi %s1087_s21, %s56_s21  }
  0x23   : > { %s66_s23 = sand.u32 7, %s1007_s21   ;;  %s67_s7 = smul.u32 48, %s65_s22 }
  0x24   : > { %s1096_s24 = sld [smem:[#allocation8 + %s1007_s21]]  ;;  %s1102_s9 = scalar_lea.sflag [#allocation5], %s1007_s21 }
  0x25   : > { %s1098_s25 = sadd.s32 %s67_s7, %s66_s23  ;;  %s726_s10 = scalar_lea.sflag %s1102_s9, 16 [#allocation5] }
  0x26   : > { %s69_s26 = scalar_lea.vmem [#allocation2], %s1098_s25  ;;  %s899_s19 = scalar_lea.hbm %s1221_s3, 2028288 }
  0x27   : > { %s72_s27 = sshll.u32 %s69_s26, 4  ;;  %s1106_s27 = int_to_ptr.vmem [resolvable:$true] %s72_s27 }
  0x28   : > { %s59_s28 = sshrl.u32 %s58_s6, 3  ;;  %s60_s29 = sand.u32 7, %s58_s6  }
  0x29   : > { %s61_s30 = smul.u32 48, %s59_s28 }
  0x2a   : > { %s77_s11 = sshrl.u32 %s1096_s24, 3  ;;  %s78_s14 = sand.u32 7, %s1096_s24  }
  0x2b   : > { %s62_s12 = sadd.s32 %s61_s30, %s60_s29  ;;  %s79_s17 = smul.u32 48, %s77_s11 }
  0x2c   : > { %s751_s13 = sshll.u32 %s62_s12, 4 }
  0x2d   : > { %s64_s0 = scalar_lea.hbm %s1221_s3, %s751_s13 }
  0x2e   : > { %s897_s1 = scalar_lea.hbm %s64_s0, 96  ;;  %p900_p11 = scmp.lt.s32.totalorder %s64_s0, %s1221_s3 }
  0x2f   : > { %p898_p10 = scmp.ne.s32.totalorder %s64_s0, %s897_s1  ;;  %p901_p12 = scmp.lt.s32.totalorder %s899_s19, %s897_s1 }
  0x31   : > { %p902_p13 = por %p901_p12, %p900_p11 }
  0x33   : > { %p903_p0 = pnand %p902_p13, %p898_p10 }
  0x35   : > { %906 = shalt.err (!%p903_p0)  }
  0x36   : > { %s907_s22 = scalar_lea.vmem %s1106_s27, 96  ;;  %s1018_s23 = smov [#allocation2]  }
  0x37   : > { %p908_p1 = scmp.ne.s32.totalorder %s1106_s27, %s907_s22  ;;  %s909_s7 = sshll.u32 %s1018_s23, 4  ;;  %s910_s7 = int_to_ptr.vmem [resolvable:$false] %s909_s7 }
  0x38   : > { %s911_s26 = scalar_lea.vmem %s910_s7, 1536  ;;  %p912_p2 = scmp.lt.s32.totalorder %s1106_s27, %s910_s7 }
  0x39   : > { %p913_p3 = scmp.lt.s32.totalorder %s911_s26, %s907_s22 }
  0x3b   : > { %p914_p4 = por %p913_p3, %p912_p2 }
  0x3d   : > { %p915_p5 = pnand %p914_p4, %p908_p1 }
  0x3f   : > { %918 = shalt.err (!%p915_p5)  }
  0x40   : > { %s1019_s28 = smov 128   ;;  %s1020_s29 = smov 1  }
  0x41   : > { %75 = dma.hbm_to_vmem [thread:$0]  %s64_s0, 96, %s1106_s27, %s1102_s9, %s1019_s28, %s1019_s28, %s1020_s29 }
  0x42   : > { %s80_s30 = sadd.s32 %s79_s17, %s78_s14  ;;  %s83_s12 = scalar_lea.vmem [#allocation3], %s1098_s25 }
  0x43   : > { %s752_s11 = sshll.u32 %s80_s30, 4  ;;  %s87_s13 = sshll.u32 %s83_s12, 4  ;;  %s88_s13 = int_to_ptr.vmem [resolvable:$true] %s87_s13 }
  0x44   : > { %s82_s1 = scalar_lea.hbm %s1222_s4, %s752_s11  ;;  %s921_s20 = scalar_lea.hbm %s1222_s4, 49152 }
  0x45   : > { %s919_s2 = scalar_lea.hbm %s82_s1, 96  ;;  %p922_p7 = scmp.lt.s32.totalorder %s82_s1, %s1222_s4 }
  0x46   : > { %p920_p6 = scmp.ne.s32.totalorder %s82_s1, %s919_s2  ;;  %p923_p8 = scmp.lt.s32.totalorder %s921_s20, %s919_s2 }
  0x48   : > { %p924_p9 = por %p923_p8, %p922_p7 }
  0x4a   : > { %p925_p10 = pnand %p924_p9, %p920_p6 }
  0x4c   : > { %928 = shalt.err (!%p925_p10)  }
  0x4d   : > { %s929_s24 = scalar_lea.vmem %s88_s13, 96  ;;  %s1021_s27 = smov [#allocation3]  }
  0x4e   : > { %p930_p11 = scmp.ne.s32.totalorder %s88_s13, %s929_s24  ;;  %s931_s14 = sshll.u32 %s1021_s27, 4  ;;  %s932_s14 = int_to_ptr.vmem [resolvable:$false] %s931_s14 }
  0x4f   : > { %s933_s0 = scalar_lea.vmem %s932_s14, 1536  ;;  %p934_p12 = scmp.lt.s32.totalorder %s88_s13, %s932_s14 }
  0x50   : > { %p935_p13 = scmp.lt.s32.totalorder %s933_s0, %s929_s24 }
  0x52   : > { %p936_p0 = por %p935_p13, %p934_p12 }
  0x54   : > { %p937_p1 = pnand %p936_p0, %p930_p11 }
  0x56   : > { %940 = shalt.err (!%p937_p1)  }
  0x57   : > { %90 = dma.hbm_to_vmem [thread:$0]  %s82_s1, 96, %s88_s13, %s726_s10, %s1019_s28, %s1019_s28, %s1020_s29 }
  0x58   : > { %s91_s17 = sld [smem:[#allocation9 + %s1007_s21]]  ;;  %s98_s23 = scalar_lea.vmem [#allocation4], %s1098_s25 }
  0x59   : > { %s102_s7 = sshll.u32 %s98_s23, 4  ;;  %s735_s12 = scalar_lea.sflag %s1102_s9, 32 [#allocation5]  ;;  %s103_s7 = int_to_ptr.vmem [resolvable:$true] %s102_s7 }
  0x5a   : > { %s943_s10 = scalar_lea.hbm %s1223_s5, 192 }
  0x5e   : > { %s92_s26 = sshrl.u32 %s91_s17, 1  ;;  %s93_s30 = sand.u32 1, %s91_s17  }
  0x5f   : > { %s94_s11 = smul.u32 12, %s92_s26 }
  0x61   : > { %s95_s15 = sadd.s32 %s94_s11, %s93_s30 }
  0x62   : > { %s753_s16 = sshll.u32 %s95_s15, 4 }
  0x63   : > { %s97_s19 = scalar_lea.hbm %s1223_s5, %s753_s16 }
  0x64   : > { %s941_s20 = scalar_lea.hbm %s97_s19, 96  ;;  %p944_p3 = scmp.lt.s32.totalorder %s97_s19, %s1223_s5 }
  0x65   : > { %p942_p2 = scmp.ne.s32.totalorder %s97_s19, %s941_s20  ;;  %p945_p4 = scmp.lt.s32.totalorder %s943_s10, %s941_s20 }
  0x67   : > { %p946_p5 = por %p945_p4, %p944_p3 }
  0x69   : > { %p947_p6 = pnand %p946_p5, %p942_p2 }
  0x6b   : > { %950 = shalt.err (!%p947_p6)  }
  0x6c   : > { %s951_s1 = scalar_lea.vmem %s103_s7, 96  ;;  %s1022_s24 = smov [#allocation4]  }
  0x6d   : > { %p952_p7 = scmp.ne.s32.totalorder %s103_s7, %s951_s1  ;;  %s953_s27 = sshll.u32 %s1022_s24, 4  ;;  %s954_s27 = int_to_ptr.vmem [resolvable:$false] %s953_s27 }
  0x6e   : > { %s955_s14 = scalar_lea.vmem %s954_s27, 1536  ;;  %p956_p8 = scmp.lt.s32.totalorder %s103_s7, %s954_s27 }
  0x6f   : > { %p957_p9 = scmp.lt.s32.totalorder %s955_s14, %s951_s1 }
  0x71   : > { %p958_p10 = por %p957_p9, %p956_p8 }
  0x73   : > { %p959_p11 = pnand %p958_p10, %p952_p7 }
  0x75   : > { %962 = shalt.err (!%p959_p11)  }
  0x76   : > { %s1023_s0 = smov 32   ;;  %s56_s21 = sadd.s32 1, %s1007_s21  }
  0x77   : > { %105 = dma.hbm_to_vmem [thread:$0]  %s97_s19, 96, %s103_s7, %s735_s12, %s1023_s0, %s1019_s28, %s1020_s29 }
  0x78   : > { %p53_p12 = scmp.ge.s32.totalorder %s56_s21, 16  }
  0x79   :  { %s1009_s17 = smov (%p53_p12), 0  }
  0x7a   :  { %55 = sbr.rel (!%p53_p12) target bundleno = 34 (0x22), region = 109 }
  0x7f LB: > { %s112_s23 = scalar_lea.sflag [#allocation5], %s1011_s17  ;;  %s1011_s17 = sphi %s1009_s17, %s111_s17  }
  0x80   : > { %997 = dma.done.wait %s112_s23, 96 }
  0x81   : > { %998 = vsyncadd %s112_s23, 4294967200  ;;  %s738_s26 = scalar_lea.sflag %s112_s23, 16 [#allocation5] }
  0x82   : > { %999 = dma.done.wait %s738_s26, 96 }
  0x83   : > { %1000 = vsyncadd %s738_s26, 4294967200  ;;  %s740_s30 = scalar_lea.sflag %s112_s23, 32 [#allocation5] }
  0x84   : > { %1001 = dma.done.wait %s740_s30, 96 }
  0x85   : > { %1002 = vsyncadd %s740_s30, 4294967200  ;;  %s111_s17 = sadd.s32 1, %s1011_s17  }
  0x86   : > { %p108_p13 = scmp.ge.s32.totalorder %s111_s17, 16  }
  0x87   :  { %v124_v0 = vld [vmem:[#allocation2] sm:$0xff] (%p108_p13)  ;;  %v125_v1 = vld [vmem:[#allocation2 + $0x8] sm:$0xff] (%p108_p13)  ;;  %v126_v2 = vld [vmem:[#allocation2 + $0x10] sm:$0xff] (%p108_p13)  ;;  %s1024_s3 = smov (%p108_p13), [#allocation15]  }
  0x88   :  { %110 = sbr.rel (!%p108_p13) target bundleno = 127 (0x7f), region = 120  ;;  %v127_v3 = vld [vmem:[#allocation2 + $0x18] sm:$0xff] (%p108_p13)  ;;  %v128_v4 = vld [vmem:[#allocation2 + $0x20] sm:$0xff] (%p108_p13)  ;;  %v129_v5 = vld [vmem:[#allocation2 + $0x28] sm:$0xff] (%p108_p13)  ;;  %s362_s4 = sshll.u32 (%p108_p13), %s1024_s3, 4  ;;  %s363_s4 = int_to_ptr.vmem [resolvable:$true] %s362_s4 }
  0x89   :  { %v136_v6 = vld [vmem:[#allocation3] sm:$0xff] (%p108_p13)  ;;  %v137_v7 = vld [vmem:[#allocation3 + $0x8] sm:$0xff] (%p108_p13)  ;;  %v138_v8 = vld [vmem:[#allocation3 + $0x10] sm:$0xff] (%p108_p13)  ;;  %s963_s5 = scalar_lea.vmem (%p108_p13), %s363_s4, 1536  ;;  %p968_p1 = scmp.lt.s32.totalorder (%p108_p13), %s363_s4, %s363_s4 }
  0x8a   :  { %v139_v9 = vld [vmem:[#allocation3 + $0x18] sm:$0xff] (%p108_p13)  ;;  %v140_v10 = vld [vmem:[#allocation3 + $0x20] sm:$0xff] (%p108_p13)  ;;  %v141_v11 = vld [vmem:[#allocation3 + $0x28] sm:$0xff] (%p108_p13)  ;;  %v148_v12 = vadd.f32 (%p108_p13), %v136_v6, %v124_v0  ;;  %v149_v13 = vadd.f32 (%p108_p13), %v137_v7, %v125_v1  ;;  %v150_v14 = vadd.f32 (%p108_p13), %v138_v8, %v126_v2  ;;  %p964_p0 = scmp.ne.s32.totalorder (%p108_p13), %s363_s4, %s963_s5  ;;  %p969_p2 = scmp.lt.s32.totalorder (%p108_p13), %s963_s5, %s963_s5 }
  0x8b   :  { %v151_v15 = vadd.f32 (%p108_p13), %v139_v9, %v127_v3  ;;  %v152_v16 = vadd.f32 (%p108_p13), %v140_v10, %v128_v4  ;;  %v160_v17 = vld [vmem:[#allocation4] sm:$0xff] (%p108_p13)  ;;  %v161_v18 = vld [vmem:[#allocation4 + $0x8] sm:$0xff] (%p108_p13)  ;;  %v162_v19 = vld [vmem:[#allocation4 + $0x10] sm:$0xff] (%p108_p13)  ;;  %v153_v25 = vadd.f32 (%p108_p13), %v141_v11, %v129_v5 }
  0x8c   :  { %v163_v20 = vld [vmem:[#allocation4 + $0x18] sm:$0xff] (%p108_p13)  ;;  %v164_v21 = vld [vmem:[#allocation4 + $0x20] sm:$0xff] (%p108_p13)  ;;  %v172_v22 = vadd.f32 (%p108_p13), %v160_v17, %v148_v12  ;;  %v173_v23 = vadd.f32 (%p108_p13), %v161_v18, %v149_v13  ;;  %v174_v24 = vadd.f32 (%p108_p13), %v162_v19, %v150_v14  ;;  %v130_v26 = vld [vmem:[#allocation2 + $0x30] sm:$0xff] (%p108_p13)  ;;  %p970_p3 = por (%p108_p13), %p969_p2, %p968_p1 }
  0x8d   :  { %v131_v27 = vld [vmem:[#allocation2 + $0x38] sm:$0xff]  ;;  %v132_v28 = vld [vmem:[#allocation2 + $0x40] sm:$0xff]  ;;  %v165_v29 = vld [vmem:[#allocation4 + $0x28] sm:$0xff]  ;;  %v175_v30 = vadd.f32 %v163_v20, %v151_v15  ;;  %v176_v34 = vadd.f32 %v164_v21, %v152_v16 }
  0x8e   :  { %v184_v31 = vadd.f32 %v173_v23, %v172_v22  ;;  %v133_v32 = vld [vmem:[#allocation2 + $0x48] sm:$0xff]  ;;  %v134_v33 = vld [vmem:[#allocation2 + $0x50] sm:$0xff]  ;;  %v135_v35 = vld [vmem:[#allocation2 + $0x58] sm:$0xff]  ;;  %v177_v46 = vadd.f32 %v165_v29, %v153_v25  ;;  %p971_p4 = pnand %p970_p3, %p964_p0 }
  0x8f   :  { %v142_v36 = vld [vmem:[#allocation3 + $0x30] sm:$0xff]  ;;  %v143_v37 = vld [vmem:[#allocation3 + $0x38] sm:$0xff]  ;;  %v144_v38 = vld [vmem:[#allocation3 + $0x40] sm:$0xff] }
  0x90   :  { %v185_v39 = vadd.f32 %v184_v31, %v174_v24  ;;  %v145_v40 = vld [vmem:[#allocation3 + $0x48] sm:$0xff]  ;;  %v146_v41 = vld [vmem:[#allocation3 + $0x50] sm:$0xff]  ;;  %v147_v42 = vld [vmem:[#allocation3 + $0x58] sm:$0xff]  ;;  %v154_v43 = vadd.f32 %v142_v36, %v130_v26  ;;  %v155_v44 = vadd.f32 %v143_v37, %v131_v27  ;;  %v156_v45 = vadd.f32 %v144_v38, %v132_v28 }
  0x91   :  { %v157_v47 = vadd.f32 %v145_v40, %v133_v32  ;;  %v158_v48 = vadd.f32 %v146_v41, %v134_v33  ;;  %v166_v49 = vld [vmem:[#allocation4 + $0x30] sm:$0xff]  ;;  %v167_v50 = vld [vmem:[#allocation4 + $0x38] sm:$0xff]  ;;  %v168_v51 = vld [vmem:[#allocation4 + $0x40] sm:$0xff]  ;;  %v159_v59 = vadd.f32 %v147_v42, %v135_v35 }
  0x92   :  { %v186_v52 = vadd.f32 %v185_v39, %v175_v30  ;;  %v169_v53 = vld [vmem:[#allocation4 + $0x48] sm:$0xff]  ;;  %v178_v54 = vadd.f32 %v166_v49, %v154_v43  ;;  %v179_v55 = vadd.f32 %v167_v50, %v155_v44  ;;  %v180_v56 = vadd.f32 %v168_v51, %v156_v45  ;;  %v170_v57 = vld [vmem:[#allocation4 + $0x50] sm:$0xff]  ;;  %v171_v62 = vld [vmem:[#allocation4 + $0x58] sm:$0xff] }
  0x93   :  { %v181_v60 = vadd.f32 %v169_v53, %v157_v47  ;;  %v182_v0 = vadd.f32 %v170_v57, %v158_v48  ;;  %v183_v2 = vadd.f32 %v171_v62, %v159_v59  ;;  %v259_v47 = vlaneseq  ;;  %v301_v59 = vld [vmem:[#allocation13] sm:$0x3f] }
  0x94   :  { %v187_v58 = vadd.f32 %v186_v52, %v176_v34  ;;  %v191_v61 = vadd.f32 %v179_v55, %v178_v54 }
  0x95   :  { %v260_v50 = vshrl.u32 %v259_v47, 7 }
  0x96   :  { %v188_v63 = vadd.f32 %v187_v58, %v177_v46  ;;  %v192_v1 = vadd.f32 %v191_v61, %v180_v56 }
  0x97   :  { %v261_v52 = vsub.s32 0, %v260_v50  ;;  %v265_v53 = vsub.s32 1, %v260_v50  ;;  %v277_v57 = vsub.s32 4, %v260_v50  ;;  %v281_v58 = vsub.s32 5, %v260_v50 }
  0x98   :  { %189 = vadd.xlane.f32.xlu0 %v188_v63  ;;  %v193_v3 = vadd.f32 %v192_v1, %v181_v60 }
  0x9a   :  { %v194_v4 = vadd.f32 %v193_v3, %v182_v0  ;;  %v306_v3 = vrot.slane %v301_v59, %v261_v52 }
  0x9c   :  { %v195_v5 = vadd.f32 %v194_v4, %v183_v2  ;;  %v310_v4 = vrot.slane %v301_v59, %v265_v53 }
  0x9e   :  { %196 = vadd.xlane.f32.xlu0 %v195_v5 }
 0x121   :  { %v190_v6 = vpop.xlane.xlu0 %189 }
 0x122   :  { %v199_v7 = vmul.f32 0.0013020834, %v190_v6 }
 0x124   :  { %v1162_v8 = vsub.f32 %v172_v22, %v199_v7  ;;  %v1164_v9 = vsub.f32 %v173_v23, %v199_v7  ;;  %v1166_v10 = vsub.f32 %v174_v24, %v199_v7  ;;  %v1168_v11 = vsub.f32 %v175_v30, %v199_v7 }
 0x125   :  { %v1174_v15 = vsub.f32 %v176_v34, %v199_v7  ;;  %v206_v19 = vsub.f32 %v177_v46, %v199_v7 }
 0x126   :  { %v213_v12 = vmul.f32 %v1162_v8, %v1162_v8  ;;  %v214_v13 = vmul.f32 %v1164_v9, %v1164_v9  ;;  %v215_v17 = vmul.f32 %v1166_v10, %v1166_v10  ;;  %v216_v20 = vmul.f32 %v1168_v11, %v1168_v11 }
 0x127   :  { %v197_v14 = vpop.xlane.xlu0 %196  ;;  %v217_v25 = vmul.f32 %v1174_v15, %v1174_v15  ;;  %v218_v30 = vmul.f32 %v206_v19, %v206_v19 }
 0x128   :  { %v200_v16 = vmul.f32 0.0013020834, %v197_v14  ;;  %v225_v18 = vadd.f32 %v214_v13, %v213_v12 }
 0x12a   :  { %v226_v21 = vadd.f32 %v225_v18, %v215_v17  ;;  %v1180_v22 = vsub.f32 %v178_v54, %v200_v16  ;;  %v1182_v23 = vsub.f32 %v179_v55, %v200_v16  ;;  %v1184_v24 = vsub.f32 %v180_v56, %v200_v16  ;;  %v257_v54 = vld [vmem:[#allocation10] sm:$0x3f] }
 0x12b   :  { %v1188_v27 = vsub.f32 %v181_v60, %v200_v16  ;;  %v1194_v32 = vsub.f32 %v182_v0, %v200_v16  ;;  %v1198_v36 = vsub.f32 %v183_v2, %v200_v16  ;;  %v269_v55 = vsub.s32 2, %v260_v50 }
 0x12c   :  { %v227_v26 = vadd.f32 %v226_v21, %v216_v20  ;;  %v219_v28 = vmul.f32 %v1180_v22, %v1180_v22  ;;  %v220_v29 = vmul.f32 %v1182_v23, %v1182_v23  ;;  %v221_v33 = vmul.f32 %v1184_v24, %v1184_v24 }
 0x12d   :  { %v222_v37 = vmul.f32 %v1188_v27, %v1188_v27  ;;  %v223_v39 = vmul.f32 %v1194_v32, %v1194_v32  ;;  %v224_v41 = vmul.f32 %v1198_v36, %v1198_v36  ;;  %v273_v56 = vsub.s32 3, %v260_v50 }
 0x12e   :  { %v228_v31 = vadd.f32 %v227_v26, %v217_v25  ;;  %v232_v34 = vadd.f32 %v220_v29, %v219_v28  ;;  %v262_v60 = vrot.slane %v257_v54, %v261_v52  ;;  %v266_v61 = vrot.slane %v257_v54, %v265_v53 }
 0x12f   :  { %v270_v62 = vrot.slane %v257_v54, %v269_v55  ;;  %v274_v63 = vrot.slane %v257_v54, %v273_v56  ;;  %v278_v0 = vrot.slane %v257_v54, %v277_v57  ;;  %v282_v1 = vrot.slane %v257_v54, %v281_v58 }
 0x130   :  { %v229_v35 = vadd.f32 %v228_v31, %v218_v30  ;;  %v233_v38 = vadd.f32 %v232_v34, %v221_v33  ;;  %v314_v5 = vrot.slane %v301_v59, %v269_v55  ;;  %v318_v6 = vrot.slane %v301_v59, %v273_v56 }
 0x131   :  { %v322_v18 = vrot.slane %v301_v59, %v277_v57  ;;  %v326_v20 = vrot.slane %v301_v59, %v281_v58 }
 0x132   :  { %230 = vadd.xlane.f32.xlu1 %v229_v35  ;;  %v234_v40 = vadd.f32 %v233_v38, %v222_v37 }
 0x134   :  { %v235_v42 = vadd.f32 %v234_v40, %v223_v39 }
 0x136   :  { %v236_v43 = vadd.f32 %v235_v42, %v224_v41 }
 0x138   :  { %237 = vadd.xlane.f32.xlu1 %v236_v43 }
 0x1bb   :  { %v231_v44 = vpop.xlane.xlu1 %230 }
 0x1bc   :  { %v239_v45 = vmul.f32 0.0013020834, %v231_v44 }
 0x1be   :  { %v241_v46 = vadd.f32 1e-12, %v239_v45 }
 0x1c0   :  { %829 = vrsqrt.f32 %v241_v46 }
 0x1c1   :  { %v238_v48 = vpop.xlane.xlu1 %237 }
 0x1c2   :  { %v240_v49 = vmul.f32 0.0013020834, %v238_v48 }
 0x1c4   :  { %v242_v51 = vadd.f32 1e-12, %v240_v49 }
 0x1c6   :  { %831 = vrsqrt.f32 %v242_v51 }
 0x1cd   :  { %v830_v2 = vpop.eup %829 }
 0x1ce   :  { %v245_v7 = vmul.f32 %v830_v2, %v1162_v8  ;;  %v246_v12 = vmul.f32 %v830_v2, %v1164_v9  ;;  %v247_v13 = vmul.f32 %v830_v2, %v1166_v10  ;;  %v248_v14 = vmul.f32 %v830_v2, %v1168_v11 }
 0x1cf   :  { %v249_v16 = vmul.f32 %v830_v2, %v1174_v15  ;;  %v250_v17 = vmul.f32 %v830_v2, %v206_v19 }
 0x1d0   :  { %v289_v21 = vmul.f32 %v262_v60, %v245_v7  ;;  %v290_v25 = vmul.f32 %v266_v61, %v246_v12  ;;  %v291_v26 = vmul.f32 %v270_v62, %v247_v13  ;;  %v292_v28 = vmul.f32 %v274_v63, %v248_v14 }
 0x1d1   :  { %v293_v29 = vmul.f32 %v278_v0, %v249_v16  ;;  %v294_v30 = vmul.f32 %v282_v1, %v250_v17 }
 0x1d2   :  { %v333_v31 = vadd.f32 %v306_v3, %v289_v21  ;;  %v334_v33 = vadd.f32 %v310_v4, %v290_v25  ;;  %v335_v8 = vadd.f32 %v314_v5, %v291_v26  ;;  %v336_v34 = vadd.f32 %v318_v6, %v292_v28 }
 0x1d3   :  { %v832_v9 = vpop.eup %831  ;;  %v337_v35 = vadd.f32 %v322_v18, %v293_v29  ;;  %v338_v10 = vadd.f32 %v326_v20, %v294_v30 }
 0x1d4   :  { %v251_v11 = vmul.f32 %v832_v9, %v1180_v22  ;;  %v252_v15 = vmul.f32 %v832_v9, %v1182_v23  ;;  %v253_v19 = vmul.f32 %v832_v9, %v1184_v24  ;;  %v254_v37 = vmul.f32 %v832_v9, %v1188_v27  ;;  %345 = vst [vmem:[#allocation15] sm:$0xff] %v333_v31 }
 0x1d5   :  { %346 = vst [vmem:[#allocation15 + $0x8] sm:$0xff] %v334_v33  ;;  %347 = vst [vmem:[#allocation15 + $0x10] sm:$0xff] %v335_v8  ;;  %v255_v38 = vmul.f32 %v832_v9, %v1194_v32  ;;  %v256_v39 = vmul.f32 %v832_v9, %v1198_v36 }
 0x1d6   :  { %348 = vst [vmem:[#allocation15 + $0x18] sm:$0xff] %v336_v34  ;;  %349 = vst [vmem:[#allocation15 + $0x20] sm:$0xff] %v337_v35  ;;  %v295_v40 = vmul.f32 %v262_v60, %v251_v11  ;;  %v296_v22 = vmul.f32 %v266_v61, %v252_v15  ;;  %v297_v41 = vmul.f32 %v270_v62, %v253_v19 }
 0x1d7   :  { %350 = vst [vmem:[#allocation15 + $0x28] sm:$0xff] %v338_v10  ;;  %v298_v23 = vmul.f32 %v274_v63, %v254_v37  ;;  %v299_v42 = vmul.f32 %v278_v0, %v255_v38  ;;  %v300_v24 = vmul.f32 %v282_v1, %v256_v39 }
 0x1d8   :  { %v339_v43 = vadd.f32 %v306_v3, %v295_v40  ;;  %v340_v27 = vadd.f32 %v310_v4, %v296_v22  ;;  %v341_v44 = vadd.f32 %v314_v5, %v297_v41 }
 0x1d9   :  { %v342_v45 = vadd.f32 %v318_v6, %v298_v23  ;;  %v343_v46 = vadd.f32 %v322_v18, %v299_v42  ;;  %v344_v47 = vadd.f32 %v326_v20, %v300_v24 }
 0x1da   :  { %351 = vst [vmem:[#allocation15 + $0x30] sm:$0xff] %v339_v43  ;;  %352 = vst [vmem:[#allocation15 + $0x38] sm:$0xff] %v340_v27 }
 0x1db   :  { %353 = vst [vmem:[#allocation15 + $0x40] sm:$0xff] %v341_v44  ;;  %354 = vst [vmem:[#allocation15 + $0x48] sm:$0xff] %v342_v45 }
 0x1dc   :  { %355 = vst [vmem:[#allocation15 + $0x50] sm:$0xff] %v343_v46  ;;  %356 = vst [vmem:[#allocation15 + $0x58] sm:$0xff] %v344_v47 }
 0x1dd   :  { %974 = shalt.err (!%p971_p4)
}
 0x1de   :  { %s1025_s21 = smov 768   ;;  %s1026_s9 = smov 48  }
 0x1df   :  { %368 = dma.vmem_to_hbm [thread:$0]  %s363_s4, 1536, %s1226_s8, [#allocation12], %s1025_s21, %s1025_s21, %s1026_s9  }
 0x1e0   :  { %1003 = dma.done.wait [#allocation12], 1536  }
 0x1e1   :  { %1004 = vsyncadd [#allocation12], 4294965760 }
 0x1e2   :  { %372 = vsyncpa [#allocation11], 1 }
 0x1e3   :  { %373 = vsyncpa [#allocation14], 1 }
 0x1e4   :  { %374 = vsyncpa [#allocation12], 1 }
 0x1e5   :  { %375 = vsyncmov [#allocation5] }
 0x1e8   :  { %s376_s7 = vpop.sfrf %375 }
 0x1e9   :  { %p754_p5 = scmp.ne.s32.totalorder %s376_s7, 0 }
 0x1eb   :  { %380 = shalt.err (%p754_p5)  }
 0x1ec   :  { %382 = vsyncmov [#allocation5 + $0x1] }
 0x1ef   :  { %s383_s11 = vpop.sfrf %382 }
 0x1f0   :  { %p755_p6 = scmp.ne.s32.totalorder %s383_s11, 0 }
 0x1f2   :  { %387 = shalt.err (%p755_p6)  }
 0x1f3   :  { %389 = vsyncmov [#allocation5 + $0x2] }
 0x1f6   :  { %s390_s12 = vpop.sfrf %389 }
 0x1f7   :  { %p756_p7 = scmp.ne.s32.totalorder %s390_s12, 0 }
 0x1f9   :  { %394 = shalt.err (%p756_p7)  }
 0x1fa   :  { %396 = vsyncmov [#allocation5 + $0x3] }
 0x1fd   :  { %s397_s15 = vpop.sfrf %396 }
 0x1fe   :  { %p757_p8 = scmp.ne.s32.totalorder %s397_s15, 0 }
 0x200   :  { %401 = shalt.err (%p757_p8)  }
 0x201   :  { %403 = vsyncmov [#allocation5 + $0x4] }
 0x204   :  { %s404_s8 = vpop.sfrf %403 }
 0x205   :  { %p758_p9 = scmp.ne.s32.totalorder %s404_s8, 0 }
 0x207   :  { %408 = shalt.err (%p758_p9)  }
 0x208   :  { %410 = vsyncmov [#allocation5 + $0x5] }
 0x20b   :  { %s411_s16 = vpop.sfrf %410 }
 0x20c   :  { %p759_p10 = scmp.ne.s32.totalorder %s411_s16, 0 }
 0x20e   :  { %415 = shalt.err (%p759_p10)  }
 0x20f   :  { %417 = vsyncmov [#allocation5 + $0x6] }
 0x212   :  { %s418_s2 = vpop.sfrf %417 }
 0x213   :  { %p760_p11 = scmp.ne.s32.totalorder %s418_s2, 0 }
 0x215   :  { %422 = shalt.err (%p760_p11)  }
 0x216   :  { %424 = vsyncmov [#allocation5 + $0x7] }
 0x219   :  { %s425_s18 = vpop.sfrf %424 }
 0x21a   :  { %p761_p12 = scmp.ne.s32.totalorder %s425_s18, 0 }
 0x21c   :  { %429 = shalt.err (%p761_p12)  }
 0x21d   :  { %431 = vsyncmov [#allocation5 + $0x8] }
 0x220   :  { %s432_s19 = vpop.sfrf %431 }
 0x221   :  { %p762_p13 = scmp.ne.s32.totalorder %s432_s19, 0 }
 0x223   :  { %436 = shalt.err (%p762_p13)  }
 0x224   :  { %438 = vsyncmov [#allocation5 + $0x9] }
 0x227   :  { %s439_s20 = vpop.sfrf %438 }
 0x228   :  { %p763_p0 = scmp.ne.s32.totalorder %s439_s20, 0 }
 0x22a   :  { %443 = shalt.err (%p763_p0)  }
 0x22b   :  { %445 = vsyncmov [#allocation5 + $0xa] }
 0x22e   :  { %s446_s6 = vpop.sfrf %445 }
 0x22f   :  { %p764_p1 = scmp.ne.s32.totalorder %s446_s6, 0 }
 0x231   :  { %450 = shalt.err (%p764_p1)  }
 0x232   :  { %452 = vsyncmov [#allocation5 + $0xb] }
 0x235   :  { %s453_s22 = vpop.sfrf %452 }
 0x236   :  { %p765_p2 = scmp.ne.s32.totalorder %s453_s22, 0 }
 0x238   :  { %457 = shalt.err (%p765_p2)  }
 0x239   :  { %459 = vsyncmov [#allocation5 + $0xc] }
 0x23c   :  { %s460_s10 = vpop.sfrf %459 }
 0x23d   :  { %p766_p3 = scmp.ne.s32.totalorder %s460_s10, 0 }
 0x23f   :  { %464 = shalt.err (%p766_p3)  }
 0x240   :  { %466 = vsyncmov [#allocation5 + $0xd] }
 0x243   :  { %s467_s13 = vpop.sfrf %466 }
 0x244   :  { %p767_p4 = scmp.ne.s32.totalorder %s467_s13, 0 }
 0x246   :  { %471 = shalt.err (%p767_p4)  }
 0x247   :  { %473 = vsyncmov [#allocation5 + $0xe] }
 0x24a   :  { %s474_s25 = vpop.sfrf %473 }
 0x24b   :  { %p768_p5 = scmp.ne.s32.totalorder %s474_s25, 0 }
 0x24d   :  { %478 = shalt.err (%p768_p5)  }
 0x24e   :  { %480 = vsyncmov [#allocation5 + $0xf] }
 0x251   :  { %s481_s1 = vpop.sfrf %480 }
 0x252   :  { %p769_p6 = scmp.ne.s32.totalorder %s481_s1, 0 }
 0x254   :  { %485 = shalt.err (%p769_p6)  }
 0x255   :  { %487 = vsyncmov [#allocation5 + $0x10] }
 0x258   :  { %s488_s24 = vpop.sfrf %487 }
 0x259   :  { %p770_p7 = scmp.ne.s32.totalorder %s488_s24, 0 }
 0x25b   :  { %492 = shalt.err (%p770_p7)  }
 0x25c   :  { %494 = vsyncmov [#allocation5 + $0x11] }
 0x25f   :  { %s495_s27 = vpop.sfrf %494 }
 0x260   :  { %p771_p8 = scmp.ne.s32.totalorder %s495_s27, 0 }
 0x262   :  { %499 = shalt.err (%p771_p8)  }
 0x263   :  { %501 = vsyncmov [#allocation5 + $0x12] }
 0x266   :  { %s502_s14 = vpop.sfrf %501 }
 0x267   :  { %p772_p9 = scmp.ne.s32.totalorder %s502_s14, 0 }
 0x269   :  { %506 = shalt.err (%p772_p9)  }
 0x26a   :  { %508 = vsyncmov [#allocation5 + $0x13] }
 0x26d   :  { %s509_s0 = vpop.sfrf %508 }
 0x26e   :  { %p773_p10 = scmp.ne.s32.totalorder %s509_s0, 0 }
 0x270   :  { %513 = shalt.err (%p773_p10)  }
 0x271   :  { %515 = vsyncmov [#allocation5 + $0x14] }
 0x274   :  { %s516_s17 = vpop.sfrf %515 }
 0x275   :  { %p774_p11 = scmp.ne.s32.totalorder %s516_s17, 0 }
 0x277   :  { %520 = shalt.err (%p774_p11)  }
 0x278   :  { %522 = vsyncmov [#allocation5 + $0x15] }
 0x27b   :  { %s523_s23 = vpop.sfrf %522 }
 0x27c   :  { %p775_p12 = scmp.ne.s32.totalorder %s523_s23, 0 }
 0x27e   :  { %527 = shalt.err (%p775_p12)  }
 0x27f   :  { %529 = vsyncmov [#allocation5 + $0x16] }
 0x282   :  { %s530_s26 = vpop.sfrf %529 }
 0x283   :  { %p776_p13 = scmp.ne.s32.totalorder %s530_s26, 0 }
 0x285   :  { %534 = shalt.err (%p776_p13)  }
 0x286   :  { %536 = vsyncmov [#allocation5 + $0x17] }
 0x289   :  { %s537_s30 = vpop.sfrf %536 }
 0x28a   :  { %p777_p0 = scmp.ne.s32.totalorder %s537_s30, 0 }
 0x28c   :  { %541 = shalt.err (%p777_p0)  }
 0x28d   :  { %543 = vsyncmov [#allocation5 + $0x18] }
 0x290   :  { %s544_s3 = vpop.sfrf %543 }
 0x291   :  { %p778_p1 = scmp.ne.s32.totalorder %s544_s3, 0 }
 0x293   :  { %548 = shalt.err (%p778_p1)  }
 0x294   :  { %550 = vsyncmov [#allocation5 + $0x19] }
 0x297   :  { %s551_s4 = vpop.sfrf %550 }
 0x298   :  { %p779_p2 = scmp.ne.s32.totalorder %s551_s4, 0 }
 0x29a   :  { %555 = shalt.err (%p779_p2)  }
 0x29b   :  { %557 = vsyncmov [#allocation5 + $0x1a] }
 0x29e   :  { %s558_s5 = vpop.sfrf %557 }
 0x29f   :  { %p780_p3 = scmp.ne.s32.totalorder %s558_s5, 0 }
 0x2a1   :  { %562 = shalt.err (%p780_p3)  }
 0x2a2   :  { %564 = vsyncmov [#allocation5 + $0x1b] }
 0x2a5   :  { %s565_s21 = vpop.sfrf %564 }
 0x2a6   :  { %p781_p4 = scmp.ne.s32.totalorder %s565_s21, 0 }
 0x2a8   :  { %569 = shalt.err (%p781_p4)  }
 0x2a9   :  { %571 = vsyncmov [#allocation5 + $0x1c] }
 0x2ac   :  { %s572_s9 = vpop.sfrf %571 }
 0x2ad   :  { %p782_p5 = scmp.ne.s32.totalorder %s572_s9, 0 }
 0x2af   :  { %576 = shalt.err (%p782_p5)  }
 0x2b0   :  { %578 = vsyncmov [#allocation5 + $0x1d] }
 0x2b3   :  { %s579_s28 = vpop.sfrf %578 }
 0x2b4   :  { %p783_p6 = scmp.ne.s32.totalorder %s579_s28, 0 }
 0x2b6   :  { %583 = shalt.err (%p783_p6)  }
 0x2b7   :  { %585 = vsyncmov [#allocation5 + $0x1e] }
 0x2ba   :  { %s586_s29 = vpop.sfrf %585 }
 0x2bb   :  { %p784_p7 = scmp.ne.s32.totalorder %s586_s29, 0 }
 0x2bd   :  { %590 = shalt.err (%p784_p7)  }
 0x2be   :  { %592 = vsyncmov [#allocation5 + $0x1f] }
 0x2c1   :  { %s593_s7 = vpop.sfrf %592 }
 0x2c2   :  { %p785_p8 = scmp.ne.s32.totalorder %s593_s7, 0 }
 0x2c4   :  { %597 = shalt.err (%p785_p8)  }
 0x2c5   :  { %599 = vsyncmov [#allocation5 + $0x20] }
 0x2c8   :  { %s600_s11 = vpop.sfrf %599 }
 0x2c9   :  { %p786_p9 = scmp.ne.s32.totalorder %s600_s11, 0 }
 0x2cb   :  { %604 = shalt.err (%p786_p9)  }
 0x2cc   :  { %606 = vsyncmov [#allocation5 + $0x21] }
 0x2cf   :  { %s607_s12 = vpop.sfrf %606 }
 0x2d0   :  { %p787_p10 = scmp.ne.s32.totalorder %s607_s12, 0 }
 0x2d2   :  { %611 = shalt.err (%p787_p10)  }
 0x2d3   :  { %613 = vsyncmov [#allocation5 + $0x22] }
 0x2d6   :  { %s614_s15 = vpop.sfrf %613 }
 0x2d7   :  { %p788_p11 = scmp.ne.s32.totalorder %s614_s15, 0 }
 0x2d9   :  { %618 = shalt.err (%p788_p11)  }
 0x2da   :  { %620 = vsyncmov [#allocation5 + $0x23] }
 0x2dd   :  { %s621_s8 = vpop.sfrf %620 }
 0x2de   :  { %p789_p12 = scmp.ne.s32.totalorder %s621_s8, 0 }
 0x2e0   :  { %625 = shalt.err (%p789_p12)  }
 0x2e1   :  { %627 = vsyncmov [#allocation5 + $0x24] }
 0x2e4   :  { %s628_s16 = vpop.sfrf %627 }
 0x2e5   :  { %p790_p13 = scmp.ne.s32.totalorder %s628_s16, 0 }
 0x2e7   :  { %632 = shalt.err (%p790_p13)  }
 0x2e8   :  { %634 = vsyncmov [#allocation5 + $0x25] }
 0x2eb   :  { %s635_s2 = vpop.sfrf %634 }
 0x2ec   :  { %p791_p0 = scmp.ne.s32.totalorder %s635_s2, 0 }
 0x2ee   :  { %639 = shalt.err (%p791_p0)  }
 0x2ef   :  { %641 = vsyncmov [#allocation5 + $0x26] }
 0x2f2   :  { %s642_s18 = vpop.sfrf %641 }
 0x2f3   :  { %p792_p1 = scmp.ne.s32.totalorder %s642_s18, 0 }
 0x2f5   :  { %646 = shalt.err (%p792_p1)  }
 0x2f6   :  { %648 = vsyncmov [#allocation5 + $0x27] }
 0x2f9   :  { %s649_s19 = vpop.sfrf %648 }
 0x2fa   :  { %p793_p2 = scmp.ne.s32.totalorder %s649_s19, 0 }
 0x2fc   :  { %653 = shalt.err (%p793_p2)  }
 0x2fd   :  { %655 = vsyncmov [#allocation5 + $0x28] }
 0x300   :  { %s656_s20 = vpop.sfrf %655 }
 0x301   :  { %p794_p3 = scmp.ne.s32.totalorder %s656_s20, 0 }
 0x303   :  { %660 = shalt.err (%p794_p3)  }
 0x304   :  { %662 = vsyncmov [#allocation5 + $0x29] }
 0x307   :  { %s663_s6 = vpop.sfrf %662 }
 0x308   :  { %p795_p4 = scmp.ne.s32.totalorder %s663_s6, 0 }
 0x30a   :  { %667 = shalt.err (%p795_p4)  }
 0x30b   :  { %669 = vsyncmov [#allocation5 + $0x2a] }
 0x30e   :  { %s670_s22 = vpop.sfrf %669 }
 0x30f   :  { %p796_p5 = scmp.ne.s32.totalorder %s670_s22, 0 }
 0x311   :  { %674 = shalt.err (%p796_p5)  }
 0x312   :  { %676 = vsyncmov [#allocation5 + $0x2b] }
 0x315   :  { %s677_s10 = vpop.sfrf %676 }
 0x316   :  { %p797_p6 = scmp.ne.s32.totalorder %s677_s10, 0 }
 0x318   :  { %681 = shalt.err (%p797_p6)  }
 0x319   :  { %683 = vsyncmov [#allocation5 + $0x2c] }
 0x31c   :  { %s684_s13 = vpop.sfrf %683 }
 0x31d   :  { %p798_p7 = scmp.ne.s32.totalorder %s684_s13, 0 }
 0x31f   :  { %688 = shalt.err (%p798_p7)  }
 0x320   :  { %690 = vsyncmov [#allocation5 + $0x2d] }
 0x323   :  { %s691_s25 = vpop.sfrf %690 }
 0x324   :  { %p799_p8 = scmp.ne.s32.totalorder %s691_s25, 0 }
 0x326   :  { %695 = shalt.err (%p799_p8)  }
 0x327   :  { %697 = vsyncmov [#allocation5 + $0x2e] }
 0x32a   :  { %s698_s1 = vpop.sfrf %697 }
 0x32b   :  { %p800_p9 = scmp.ne.s32.totalorder %s698_s1, 0 }
 0x32d   :  { %702 = shalt.err (%p800_p9)  }
 0x32e   :  { %704 = vsyncmov [#allocation5 + $0x2f] }
 0x331   :  { %s705_s24 = vpop.sfrf %704 }
 0x332   :  { %p801_p10 = scmp.ne.s32.totalorder %s705_s24, 0 }
 0x334   :  { %709 = shalt.err (%p801_p10)  }

</bundles_post_ra>
